<compile_context>
chip_gen: v5e
topology: v5e:2x2
jax: 0.10.0
libtpu: 0.0.40
codegen_flags: <defaults>
</compile_context>

<pallas_src>
import math
import numpy as np
import jax
import jax.numpy as jnp
from jax import lax
from jax.experimental import pallas as pl
from jax.experimental.pallas import tpu as pltpu

SMEM_SPEC = pl.BlockSpec(memory_space=pltpu.MemorySpace.SMEM)
_NT = (((1,), (1,)), ((), ()))   # contract dim 1 of both operands == x @ w.T
_F32 = jnp.float32


def _round_up(x, m):
    return ((x + m - 1) // m) * m


def _lcm(a, b):
    return a * b // math.gcd(a, b)


def _apply_nonlin(x, kind):
    if kind == "relu":
        return jnp.maximum(x, 0.0)
    if kind == "tanh":
        return jnp.tanh(x)
    if kind == "sigmoid":
        return jax.nn.sigmoid(x)
    if kind == "elu":
        return jnp.where(x > 0, x, jnp.exp(x) - 1.0)
    return x  # 'linear'


def _sampler(key, mean, log_var):
    """Reparameterization trick: mean + exp(0.5*log_var) * eps."""
    eps = jax.random.normal(key, mean.shape, dtype=mean.dtype)
    return jnp.exp(0.5 * log_var) * eps + mean


# ----------------------------------------------------------------------------
# Fused kernel
#   refs = [scale(SMEM), z, (W0,b0)...(W_{L-1},b_{L-1}), (P)?, bias_tiles, G,
#           W_tile(streamed), out]
#   Hidden weights come in their natural (out, in) orientation and are
#   contracted with an NT dot_general (no wrapper transposes).
# ----------------------------------------------------------------------------
def make_decoder_kernel(num_hidden, first_nonlin, last_nonlin, has_proj):
    def kernel(*refs):
        scale_ref, z_ref = refs[0], refs[1]
        idx = 2

        # ---- tiny Bayesian MLP (f32, VMEM-resident weights; recomputed per
        # grid step -- negligible next to the streamed weight tile) ----------
        x = z_ref[...]
        for li in range(num_hidden):
            w_ref, b_ref = refs[idx], refs[idx + 1]
            idx += 2
            y = lax.dot_general(x, w_ref[...], _NT,
                                preferred_element_type=jnp.float32)
            y = y + b_ref[...]
            kind = first_nonlin if li < num_hidden - 1 else last_nonlin
            x = _apply_nonlin(y, kind)
        if has_proj:                     # folded 1x1-conv: x @ blockdiag(C_w^T)
            x = jnp.dot(x, refs[idx][...], preferred_element_type=jnp.float32)
            idx += 1

        bias_ref, g_ref, w_ref = refs[idx], refs[idx + 1], refs[idx + 2]
        out_ref = refs[idx + 3]
        j = pl.program_id(0)

        # ---- streamed projection tile: logits = x @ W_tile^T ----------------
        w = w_ref[...].astype(jnp.float32)       # bf16 HBM stream -> f32 MACs
        logits = lax.dot_general(x, w, _NT, preferred_element_type=jnp.float32)
        logits = (logits + bias_ref[pl.ds(j, 1), :]) * scale_ref[0]

        # ---- lane-dense grouped log-softmax over the alphabet ---------------
        # Row max of the whole tile is a valid (shift-invariant) stabilizer for
        # every group; per-group sums and the broadcast back go through the
        # tiny 0/1 indicator matrix G on the MXU -- no vreg relayout, no
        # width-A masked cross-lane reductions.
        m = jnp.max(logits, axis=-1, keepdims=True)
        lp = logits - m
        e = jnp.exp(lp)
        gsum = jnp.dot(e, g_ref[...], preferred_element_type=jnp.float32)
        lse = jnp.log(jnp.maximum(gsum, 1e-30))   # guard exp-sum underflow
        lse_b = lax.dot_general(lse, g_ref[...], _NT,
                                preferred_element_type=jnp.float32)
        out_ref[...] = (lp - lse_b).astype(out_ref.dtype)

    return kernel


# ----------------------------------------------------------------------------
# Generation-aware VMEM budgeting & tile picking
# ----------------------------------------------------------------------------
def _vmem_budget_bytes():
    cap = 64 * 1024 * 1024                      # conservative (v7x per-core)
    try:
        info = pltpu.get_tpu_info()
        cap = int(getattr(info, "vmem_capacity_bytes", cap) or cap)
    except Exception:
        pass
    return int(cap * 0.6)                       # headroom for Mosaic internals


def _pick_out_tile(SA_pad, A, K_pad, w_itemsize, B_pad, resident_bytes, budget):
    """Largest tile of the (padded) seq*alphabet axis that is a multiple of
    lcm(A, 128), divides SA_pad and keeps ALL VMEM residents under budget;
    prefers >=4 grid steps (>=2 per TensorCore on 2-TC v7x), then >=2."""
    L = _lcm(A, 128)
    nL = SA_pad // L
    cands = []
    for d in range(1, nL + 1):
        if nL % d:
            continue
        tn = L * d
        g = tn // A
        need = (resident_bytes
                + 3 * tn * K_pad * w_itemsize     # up-to-triple-buffered W tiles
                + 2 * B_pad * tn * 4              # double-buffered f32 output
                + 2 * tn * g * 4                  # resident group indicator G
                + 12 * B_pad * tn * 4)            # in-kernel f32 temporaries
        if need <= budget:
            cands.append(tn)
    if not cands:
        cands = [L]
    for min_steps in (4, 2, 1):
        ok = [t for t in cands if SA_pad // t >= min_steps]
        if ok:
            return max(ok)
    return max(cands)


# ----------------------------------------------------------------------------
# Parameter initialization (deterministic, matching module __init__ shapes)
# ----------------------------------------------------------------------------
def init_params(cfg, key):
    hs = cfg["hidden_layers_sizes"]
    zd, S, A = cfg["z_dim"], cfg["seq_len"], cfg["alphabet_size"]
    C = cfg["convolution_output_depth"] if cfg["convolve_output"] else A
    H = hs[-1]
    mu_bias_init, logvar_init = 0.1, -10.0

    keys = jax.random.split(key, 4 + 2 * len(hs))
    ki = 0
    p = {"hidden": []}
    in_dim = zd
    for h in hs:
        bound = 1.0 / np.sqrt(in_dim)
        w_mean = jax.random.uniform(keys[ki], (h, in_dim), jnp.float32,
                                    minval=-bound, maxval=bound); ki += 1
        b_mean = jnp.full((h,), mu_bias_init, jnp.float32)
        w_lv = jnp.full((h, in_dim), logvar_init, jnp.float32)
        b_lv = jnp.full((h,), logvar_init, jnp.float32)
        p["hidden"].append((w_mean, b_mean, w_lv, b_lv))
        in_dim = h

    std = np.sqrt(2.0 / (C * S + H))                       # xavier_normal_
    p["Wout_mean"] = std * jax.random.normal(keys[ki], (C * S, H), jnp.float32); ki += 1
    p["Wout_logvar"] = jnp.full((C * S, H), logvar_init, jnp.float32)
    p["bout_mean"] = jnp.full((A * S,), mu_bias_init, jnp.float32)
    p["bout_logvar"] = jnp.full((A * S,), logvar_init, jnp.float32)

    if cfg["convolve_output"]:
        p["conv_mean"] = (jax.random.normal(keys[ki], (A, C, 1), jnp.float32)
                          / np.sqrt(C)); ki += 1
        p["conv_logvar"] = jnp.full((A, C, 1), logvar_init, jnp.float32)
    if cfg["include_sparsity"]:
        t = H // cfg["num_tiles_sparsity"]
        p["sp_mean"] = jnp.zeros((t, S), jnp.float32)
        p["sp_logvar"] = jnp.full((t, S), logvar_init, jnp.float32)
    if cfg["include_temperature_scaler"]:
        p["temp_mean"] = jnp.ones((1,), jnp.float32)
        p["temp_logvar"] = jnp.full((1,), logvar_init, jnp.float32)
    return p


def sample_decoder_weights(params, cfg, key):
    """Draw all Bayesian weights once (same draws used by Pallas and reference)."""
    hs = cfg["hidden_layers_sizes"]
    keys = jax.random.split(key, 2 * len(hs) + 5)
    ki = 0
    s = {"hidden": []}
    for (wm, bm, wlv, blv) in params["hidden"]:
        w = _sampler(keys[ki], wm, wlv); ki += 1
        b = _sampler(keys[ki], bm, blv); ki += 1
        s["hidden"].append((w, b))
    s["W_out"] = _sampler(keys[ki], params["Wout_mean"], params["Wout_logvar"]); ki += 1
    s["b_out"] = _sampler(keys[ki], params["bout_mean"], params["bout_logvar"]); ki += 1
    if cfg["convolve_output"]:
        s["conv_w"] = _sampler(keys[ki], params["conv_mean"], params["conv_logvar"]); ki += 1
    if cfg["include_sparsity"]:
        s["sp"] = _sampler(keys[ki], params["sp_mean"], params["sp_logvar"]); ki += 1
    if cfg["include_temperature_scaler"]:
        s["temp"] = _sampler(keys[ki], params["temp_mean"], params["temp_logvar"]); ki += 1
    return s


# ----------------------------------------------------------------------------
# Pallas forward
# ----------------------------------------------------------------------------
def forward_pallas(sampled, z, cfg, weight_dtype=jnp.float32):
    """Decoder forward pass in one fused Pallas kernel.

    `weight_dtype` only controls the HBM stream of the big projection weight
    (the kernel is memory-bound on it at ~2*B flops/byte); the MLP weights,
    all activations, accumulation and the log-softmax stay in f32.
    """
    hs = cfg["hidden_layers_sizes"]
    S, A, H = cfg["seq_len"], cfg["alphabet_size"], hs[-1]
    SA = S * A
    B = z.shape[0]
    B_pad = max(8, _round_up(B, 8))       # f32 activations -> 8-row sublane pad

    # ---- sparsity gate per row p = h*S + s of the flat output weight --------
    gate = None
    if cfg["include_sparsity"]:
        sp_tiled = jnp.tile(sampled["sp"], (cfg["num_tiles_sparsity"], 1))   # (H, S)
        gate = jax.nn.sigmoid(sp_tiled).reshape(H * S, 1).astype(_F32)

    # ---- output-weight restructuring (layout plumbing; no HBM transpose) ----
    # Torch's scrambled `.view(seq*alphabet, H)` is reproduced exactly by pure
    # row-major regroups.  With convolution we pick the representation with
    # the SMALLER streamed matrix (review item: avoid a huge dense P at scale):
    #   factored : stream (SA, K=(H/A)*C), fold C_w via a small block-diag P
    #   assembled: stream (SA, H), fold C_w into the weight in the wrapper
    P = None
    if cfg["convolve_output"]:
        C = cfg["convolution_output_depth"]
        C_w = sampled["conv_w"].reshape(C, A).astype(_F32)      # torch .view
        W_flat = sampled["W_out"].reshape(S * H, C).astype(_F32)
        Wg = W_flat * gate if gate is not None else W_flat
        if H % A == 0 and (H // A) * C < H:
            K = (H // A) * C
            Wg2 = Wg.reshape(SA, K)                             # row-major regroup
            P = jnp.kron(jnp.eye(H // A, dtype=_F32), C_w.T)    # (H, K) blockdiag
        else:
            K = H
            Wg2 = jnp.dot(Wg, C_w).reshape(SA, H)
    else:
        K = H
        W_rows = sampled["W_out"].reshape(H * S, A).astype(_F32)
        Wg = W_rows * gate if gate is not None else W_rows
        Wg2 = Wg.reshape(SA, H)

    # ---- lane-density padding ------------------------------------------------
    K_pad = _round_up(K, 128)                        # contraction dim
    L = _lcm(A, 128)                                 # whole groups & 128 lanes
    SA_pad = _round_up(SA, L)

    Wg2 = jnp.pad(Wg2, ((0, SA_pad - SA), (0, K_pad - K)))
    b_out = jnp.pad(sampled["b_out"].astype(_F32), ((0, SA_pad - SA),))

    hidden = [(w.astype(_F32), b.astype(_F32)) for (w, b) in sampled["hidden"]]
    if P is not None:
        P = jnp.pad(P, ((0, 0), (0, K_pad - K)))
    elif K_pad > K:
        # no activation-side fold: lane-pad the LAST hidden layer so the MLP
        # output is (B_pad, K_pad); the matching zero columns of Wg2 nullify
        # whatever the nonlinearity produces on the padded lanes.
        wL, bL = hidden[-1]
        hidden[-1] = (jnp.pad(wL, ((0, K_pad - K), (0, 0))),
                      jnp.pad(bL, ((0, K_pad - K),)))

    # ---- temperature: stable softplus, passed as an f32 scalar through SMEM --
    if cfg["include_temperature_scaler"]:
        scale = jax.nn.softplus(sampled["temp"].astype(_F32)).reshape(1)
    else:
        scale = jnp.ones((1,), _F32)

    z_p = jnp.pad(z.astype(_F32), ((0, B_pad - B), (0, 0)))

    # ---- tile pick: account for EVERY VMEM resident, generation-aware budget -
    mlp_inputs = []
    for (w, b) in hidden:
        mlp_inputs += [w, b.reshape(1, -1)]
    residents = [z_p] + mlp_inputs + ([P] if P is not None else [])
    resident_bytes = 2 * sum(int(np.prod(a.shape)) * a.dtype.itemsize
                             for a in residents)
    resident_bytes += 2 * SA_pad * 4                              # bias tiles
    w_itemsize = jnp.dtype(weight_dtype).itemsize
    budget = _vmem_budget_bytes()
    tn = _pick_out_tile(SA_pad, A, K_pad, w_itemsize, B_pad, resident_bytes, budget)
    steps = SA_pad // tn
    g = tn // A

    # group-indicator matrix: G[c, j] = 1 iff output lane c belongs to group j
    G = jnp.asarray((np.arange(tn)[:, None] // A == np.arange(g)[None, :])
                    .astype(np.float32))
    bias_tiles = b_out.reshape(steps, tn)        # VMEM-resident; row j per step
    Wg2 = Wg2.astype(weight_dtype)

    # ---- specs ----------------------------------------------------------------
    const2 = lambda j: (0, 0)
    in_specs = [SMEM_SPEC, pl.BlockSpec(z_p.shape, const2)]
    in_specs += [pl.BlockSpec(a.shape, const2) for a in mlp_inputs]
    if P is not None:
        in_specs.append(pl.BlockSpec(P.shape, const2))
    in_specs.append(pl.BlockSpec(bias_tiles.shape, const2))
    in_specs.append(pl.BlockSpec(G.shape, const2))
    w_spec_kwargs = {}
    if steps >= 8:
        # deep grids: hide DMA latency behind more in-flight weight tiles
        w_spec_kwargs["pipeline_mode"] = pl.Buffered(3)
    in_specs.append(pl.BlockSpec((tn, K_pad), lambda j: (j, 0), **w_spec_kwargs))

    out_specs = pl.BlockSpec((B_pad, tn), lambda j: (0, j))    # lane-dense store

    mlp_macs = 0
    d_in = z_p.shape[1]
    for (w, _) in hidden:
        mlp_macs += d_in * w.shape[0]
        d_in = w.shape[0]
    if P is not None:
        mlp_macs += d_in * P.shape[1]
    cost = pl.CostEstimate(
        flops=int(2 * B_pad * (SA_pad * K_pad + steps * mlp_macs + 2 * SA_pad * g)),
        transcendentals=int(B_pad * (SA_pad + SA_pad // A)),
        bytes_accessed=int(SA_pad * K_pad * w_itemsize + resident_bytes
                           + B_pad * SA_pad * 4),
    )

    inputs = [scale, z_p, *mlp_inputs]
    if P is not None:
        inputs.append(P)
    inputs += [bias_tiles, G, Wg2]

    out_pad = pl.pallas_call(
        make_decoder_kernel(len(hs), cfg["first_hidden_nonlinearity"],
                            cfg["last_hidden_nonlinearity"], P is not None),
        out_shape=jax.ShapeDtypeStruct((B_pad, SA_pad), _F32),
        grid=(steps,),
        in_specs=in_specs,
        out_specs=out_specs,
        compiler_params=pltpu.CompilerParams(
            dimension_semantics=("parallel",),
            vmem_limit_bytes=int(budget)),
        cost_estimate=cost,
    )(*inputs)

    # free row-major split of the padded lane axis (padded groups sliced off)
    return out_pad[:B, :SA].reshape(B, S, A)


# ----------------------------------------------------------------------------
# Pure-JAX reference (mirrors the PyTorch forward exactly)
# ----------------------------------------------------------------------------
def forward_ref(sampled, z, cfg):
    hs = cfg["hidden_layers_sizes"]
    S, A, H = cfg["seq_len"], cfg["alphabet_size"], hs[-1]
    C = cfg["convolution_output_depth"] if cfg["convolve_output"] else A
    x = z
    for i, (w, b) in enumerate(sampled["hidden"]):
        kind = (cfg["first_hidden_nonlinearity"] if i < len(hs) - 1
                else cfg["last_hidden_nonlinearity"])
        x = _apply_nonlin(x @ w.T + b, kind)
    W_out = sampled["W_out"]
    if cfg["convolve_output"]:
        W_out = W_out.reshape(S * H, C) @ sampled["conv_w"].reshape(C, A)
    if cfg["include_sparsity"]:
        sp_tiled = jax.nn.sigmoid(
            jnp.tile(sampled["sp"], (cfg["num_tiles_sparsity"], 1)))[:, :, None]
        W_out = W_out.reshape(H, S, A) * sp_tiled
    W_out = W_out.reshape(S * A, H)
    x = x @ W_out.T + sampled["b_out"]
    if cfg["include_temperature_scaler"]:
        x = jax.nn.softplus(sampled["temp"]) * x
    x = x.reshape(z.shape[0], S, A)
    return jax.nn.log_softmax(x, axis=-1)


# ----------------------------------------------------------------------------
if __name__ == "__main__":
    cfg_demo = dict(            # C > A  -> assembled-weight path, SA already 128-aligned
        seq_len=64, alphabet_size=4, hidden_layers_sizes=[32, 64], z_dim=8,
        dropout_proba=0.0, convolve_output=True, convolution_output_depth=5,
        include_temperature_scaler=True, include_sparsity=True,
        num_tiles_sparsity=4,
        first_hidden_nonlinearity="relu", last_hidden_nonlinearity="sigmoid",
    )
    cfg_alt = dict(             # C < A  -> factored path (block-diag P), padded SA
        seq_len=33, alphabet_size=20, hidden_layers_sizes=[24, 40], z_dim=6,
        dropout_proba=0.0, convolve_output=True, convolution_output_depth=8,
        include_temperature_scaler=True, include_sparsity=True,
        num_tiles_sparsity=2,
        first_hidden_nonlinearity="tanh", last_hidden_nonlinearity="relu",
    )

    key = jax.random.PRNGKey(0)
    B = 2
    for cfg in (cfg_demo, cfg_alt):
        k_param, k_sample, k_z = jax.random.split(key, 3)
        params = init_params(cfg, k_param)
        sampled = sample_decoder_weights(params, cfg, k_sample)
        z = jax.random.normal(k_z, (B, cfg["z_dim"]), jnp.float32)

        ref = forward_ref(sampled, z, cfg)

        # f32 path (tolerance allows for MXU multi-pass f32 vs XLA reference)
        out_f32 = jax.block_until_ready(forward_pallas(sampled, z, cfg, jnp.float32))
        assert out_f32.shape == (B, cfg["seq_len"], cfg["alphabet_size"])
        np.testing.assert_allclose(np.asarray(out_f32), np.asarray(ref),
                                   atol=1e-3, rtol=1e-3)

        # bf16 streaming of the big projection weight only (f32 everything else)
        out_bf16 = jax.block_until_ready(forward_pallas(sampled, z, cfg, jnp.bfloat16))
        np.testing.assert_allclose(np.asarray(out_bf16), np.asarray(ref),
                                   atol=1e-1, rtol=1e-1)

    print("KERNEL_OK")
</pallas_src>

<mosaic_0001>
module attributes {stable_mosaic.version = 11 : i64} {
  func.func @kernel(%arg0: i32, %arg1: memref<1xf32, #tpu.memory_space<smem>>, %arg2: memref<8x8xf32, #tpu.memory_space<vmem>>, %arg3: memref<32x8xf32, #tpu.memory_space<vmem>>, %arg4: memref<1x32xf32, #tpu.memory_space<vmem>>, %arg5: memref<128x32xf32, #tpu.memory_space<vmem>>, %arg6: memref<1x128xf32, #tpu.memory_space<vmem>>, %arg7: memref<2x128xf32, #tpu.memory_space<vmem>>, %arg8: memref<128x32xf32, #tpu.memory_space<vmem>>, %arg9: memref<128x128xf32, #tpu.memory_space<vmem>>, %arg10: memref<8x128xf32, #tpu.memory_space<vmem>>) attributes {dimension_semantics = [#tpu.dimension_semantics<parallel>], iteration_bounds = array<i64: 2>, scalar_prefetch = 0 : i64, scratch_operands = 0 : i64, tpu.core_type = #tpu.core_type<tc>, window_params = [{transform_indices = @transform_0, window_bounds = array<i64: 1>}, {pipeline_mode = #tpu.pipeline_mode<synchronous>, transform_indices = @transform_1, window_bounds = array<i64: 8, 8>}, {pipeline_mode = #tpu.pipeline_mode<synchronous>, transform_indices = @transform_2, window_bounds = array<i64: 32, 8>}, {pipeline_mode = #tpu.pipeline_mode<synchronous>, transform_indices = @transform_3, window_bounds = array<i64: 1, 32>}, {pipeline_mode = #tpu.pipeline_mode<synchronous>, transform_indices = @transform_4, window_bounds = array<i64: 128, 32>}, {pipeline_mode = #tpu.pipeline_mode<synchronous>, transform_indices = @transform_5, window_bounds = array<i64: 1, 128>}, {pipeline_mode = #tpu.pipeline_mode<synchronous>, transform_indices = @transform_6, window_bounds = array<i64: 2, 128>}, {pipeline_mode = #tpu.pipeline_mode<synchronous>, transform_indices = @transform_7, window_bounds = array<i64: 128, 32>}, {transform_indices = @transform_8, window_bounds = array<i64: 128, 128>}, {transform_indices = @transform_9, window_bounds = array<i64: 8, 128>}]} {
    %c0 = arith.constant 0 : index
    %c0_0 = arith.constant 0 : index
    %0 = vector.load %arg2[%c0, %c0_0] : memref<8x8xf32, #tpu.memory_space<vmem>>, vector<8x8xf32>
    %c0_1 = arith.constant 0 : index
    %c0_2 = arith.constant 0 : index
    %1 = vector.load %arg3[%c0_1, %c0_2] : memref<32x8xf32, #tpu.memory_space<vmem>>, vector<32x8xf32>
    %cst = arith.constant dense<0.000000e+00> : vector<8x32xf32>
    %2 = tpu.matmul %0, %1, %cst {dimension_numbers = #tpu.dot_dimension_numbers<[1], [1], [0], [0], [0, 0, 1, 0], [], []>} : vector<8x8xf32>, vector<32x8xf32>, vector<8x32xf32> -> vector<8x32xf32>
    %c0_3 = arith.constant 0 : index
    %c0_4 = arith.constant 0 : index
    %3 = vector.load %arg4[%c0_3, %c0_4] : memref<1x32xf32, #tpu.memory_space<vmem>>, vector<1x32xf32>
    %4 = vector.broadcast %3 : vector<1x32xf32> to vector<8x32xf32>
    %5 = arith.addf %2, %4 : vector<8x32xf32>
    %cst_5 = arith.constant 0.000000e+00 : f32
    %6 = vector.broadcast %cst_5 : f32 to vector<8x32xf32>
    %7 = arith.maximumf %5, %6 : vector<8x32xf32>
    %c0_6 = arith.constant 0 : index
    %c0_7 = arith.constant 0 : index
    %8 = vector.load %arg5[%c0_6, %c0_7] : memref<128x32xf32, #tpu.memory_space<vmem>>, vector<128x32xf32>
    %cst_8 = arith.constant dense<0.000000e+00> : vector<8x128xf32>
    %9 = tpu.matmul %7, %8, %cst_8 {dimension_numbers = #tpu.dot_dimension_numbers<[1], [1], [0], [0], [0, 0, 1, 0], [], []>} : vector<8x32xf32>, vector<128x32xf32>, vector<8x128xf32> -> vector<8x128xf32>
    %c0_9 = arith.constant 0 : index
    %c0_10 = arith.constant 0 : index
    %10 = vector.load %arg6[%c0_9, %c0_10] : memref<1x128xf32, #tpu.memory_space<vmem>>, vector<1x128xf32>
    %11 = vector.broadcast %10 : vector<1x128xf32> to vector<8x128xf32>
    %12 = arith.addf %9, %11 : vector<8x128xf32>
    %13 = arith.negf %12 : vector<8x128xf32>
    %14 = math.exp %13 : vector<8x128xf32>
    %cst_11 = arith.constant 1.000000e+00 : f32
    %15 = vector.broadcast %cst_11 : f32 to vector<8x128xf32>
    %16 = arith.addf %15, %14 : vector<8x128xf32>
    %17 = arith.divf %15, %16 : vector<8x128xf32>
    %c0_12 = arith.constant 0 : index
    %c0_13 = arith.constant 0 : index
    %18 = vector.load %arg9[%c0_12, %c0_13] : memref<128x128xf32, #tpu.memory_space<vmem>>, vector<128x128xf32>
    %cst_14 = arith.constant dense<0.000000e+00> : vector<8x128xf32>
    %19 = tpu.matmul %17, %18, %cst_14 {dimension_numbers = #tpu.dot_dimension_numbers<[1], [1], [0], [0], [0, 0, 1, 0], [], []>} : vector<8x128xf32>, vector<128x128xf32>, vector<8x128xf32> -> vector<8x128xf32>
    %20 = arith.index_cast %arg0 : i32 to index
    %c0_15 = arith.constant 0 : index
    %21 = vector.load %arg7[%20, %c0_15] : memref<2x128xf32, #tpu.memory_space<vmem>>, vector<1x128xf32>
    %22 = vector.broadcast %21 : vector<1x128xf32> to vector<8x128xf32>
    %23 = arith.addf %19, %22 : vector<8x128xf32>
    %c0_16 = arith.constant 0 : index
    %24 = memref.load %arg1[%c0_16] : memref<1xf32, #tpu.memory_space<smem>>
    %25 = vector.broadcast %24 : f32 to vector<8x128xf32>
    %26 = arith.mulf %23, %25 : vector<8x128xf32>
    %cst_17 = arith.constant dense<0xFF800000> : vector<8xf32>
    %27 = vector.multi_reduction <maximumf>, %26, %cst_17 [1] : vector<8x128xf32> to vector<8xf32>
    %28 = vector.shape_cast %27 : vector<8xf32> to vector<8x1xf32>
    %29 = vector.broadcast %28 : vector<8x1xf32> to vector<8x128xf32>
    %30 = arith.subf %26, %29 : vector<8x128xf32>
    %31 = math.exp %30 : vector<8x128xf32>
    %c0_18 = arith.constant 0 : index
    %c0_19 = arith.constant 0 : index
    %32 = vector.load %arg8[%c0_18, %c0_19] : memref<128x32xf32, #tpu.memory_space<vmem>>, vector<128x32xf32>
    %cst_20 = arith.constant dense<0.000000e+00> : vector<8x32xf32>
    %33 = tpu.matmul %31, %32, %cst_20 {dimension_numbers = #tpu.dot_dimension_numbers<[1], [0], [0], [1], [0, 0, 1, 1], [], []>} : vector<8x128xf32>, vector<128x32xf32>, vector<8x32xf32> -> vector<8x32xf32>
    %cst_21 = arith.constant 1.000000e-30 : f32
    %34 = vector.broadcast %cst_21 : f32 to vector<8x32xf32>
    %35 = arith.maximumf %33, %34 : vector<8x32xf32>
    %36 = math.log %35 : vector<8x32xf32>
    %c0_22 = arith.constant 0 : index
    %c0_23 = arith.constant 0 : index
    %37 = vector.load %arg8[%c0_22, %c0_23] : memref<128x32xf32, #tpu.memory_space<vmem>>, vector<128x32xf32>
    %cst_24 = arith.constant dense<0.000000e+00> : vector<8x128xf32>
    %38 = tpu.matmul %36, %37, %cst_24 {dimension_numbers = #tpu.dot_dimension_numbers<[1], [1], [0], [0], [0, 0, 1, 0], [], []>} : vector<8x32xf32>, vector<128x32xf32>, vector<8x128xf32> -> vector<8x128xf32>
    %39 = arith.subf %30, %38 : vector<8x128xf32>
    %c0_25 = arith.constant 0 : index
    %c0_26 = arith.constant 0 : index
    %40 = vector.load %arg10[%c0_25, %c0_26] : memref<8x128xf32, #tpu.memory_space<vmem>>, vector<8x128xf32>
    tpu.vector_store %arg10[%c0_25, %c0_26], %39 {strides = array<i32>} : memref<8x128xf32, #tpu.memory_space<vmem>>, vector<8x128xf32>,
    return
  }
  func.func @transform_0(%arg0: i32) -> i32 {
    %c0_i32 = arith.constant 0 : i32
    %c0_i32_0 = arith.constant 0 : i32
    return %c0_i32 : i32
  }
  func.func @transform_1(%arg0: i32) -> (i32, i32) {
    %c0_i32 = arith.constant 0 : i32
    %c0_i32_0 = arith.constant 0 : i32
    %c0_i32_1 = arith.constant 0 : i32
    return %c0_i32, %c0_i32_0 : i32, i32
  }
  func.func @transform_2(%arg0: i32) -> (i32, i32) {
    %c0_i32 = arith.constant 0 : i32
    %c0_i32_0 = arith.constant 0 : i32
    %c0_i32_1 = arith.constant 0 : i32
    return %c0_i32, %c0_i32_0 : i32, i32
  }
  func.func @transform_3(%arg0: i32) -> (i32, i32) {
    %c0_i32 = arith.constant 0 : i32
    %c0_i32_0 = arith.constant 0 : i32
    %c0_i32_1 = arith.constant 0 : i32
    return %c0_i32, %c0_i32_0 : i32, i32
  }
  func.func @transform_4(%arg0: i32) -> (i32, i32) {
    %c0_i32 = arith.constant 0 : i32
    %c0_i32_0 = arith.constant 0 : i32
    %c0_i32_1 = arith.constant 0 : i32
    return %c0_i32, %c0_i32_0 : i32, i32
  }
  func.func @transform_5(%arg0: i32) -> (i32, i32) {
    %c0_i32 = arith.constant 0 : i32
    %c0_i32_0 = arith.constant 0 : i32
    %c0_i32_1 = arith.constant 0 : i32
    return %c0_i32, %c0_i32_0 : i32, i32
  }
  func.func @transform_6(%arg0: i32) -> (i32, i32) {
    %c0_i32 = arith.constant 0 : i32
    %c0_i32_0 = arith.constant 0 : i32
    %c0_i32_1 = arith.constant 0 : i32
    return %c0_i32, %c0_i32_0 : i32, i32
  }
  func.func @transform_7(%arg0: i32) -> (i32, i32) {
    %c0_i32 = arith.constant 0 : i32
    %c0_i32_0 = arith.constant 0 : i32
    %c0_i32_1 = arith.constant 0 : i32
    return %c0_i32, %c0_i32_0 : i32, i32
  }
  func.func @transform_8(%arg0: i32) -> (i32, i32) {
    %c0_i32 = arith.constant 0 : i32
    %c0_i32_0 = arith.constant 0 : i32
    return %arg0, %c0_i32 : i32, i32
  }
  func.func @transform_9(%arg0: i32) -> (i32, i32) {
    %c0_i32 = arith.constant 0 : i32
    %c0_i32_0 = arith.constant 0 : i32
    return %c0_i32, %arg0 : i32, i32
  }
}

</mosaic_0001>

<bundles_post_ra>
// kernel: tpu_custom_call.1
= control target key start
LH: loop header
LB: loop body
LE: loop exit
PB: predicated region body
PF: predicated region fallthrough
CT: control target
= control target key end

     0   :  { %s1211_s0 = inlined_call_operand.<no memory space> [shape: f32[1], index: 0, kind: input, shape index: {}]   ;;  %s1212_s1 = inlined_call_operand.vmem [shape: f32[8,8], index: 1, kind: input, shape index: {}]   ;;  %s1213_s2 = inlined_call_operand.vmem [shape: f32[32,8], index: 2, kind: input, shape index: {}]   ;;  %s1214_s3 = inlined_call_operand.vmem [shape: f32[1,32], index: 3, kind: input, shape index: {}]   ;;  %s1215_s4 = inlined_call_operand.vmem [shape: f32[128,32], index: 4, kind: input, shape index: {}]   ;;  %s1216_s5 = inlined_call_operand.vmem [shape: f32[1,128], index: 5, kind: input, shape index: {}]   ;;  %s1217_s6 = inlined_call_operand.vmem [shape: f32[2,128], index: 6, kind: input, shape index: {}]   ;;  %s1218_s7 = inlined_call_operand.vmem [shape: f32[128,32], index: 7, kind: input, shape index: {}]   ;;  %s1219_s8 = inlined_call_operand.vmem [shape: f32[256,128], index: 8, kind: input, shape index: {}]   ;;  %s1220_s9 = inlined_call_operand.hbm [shape: f32[8,256], index: 9, kind: output, shape index: {}]  }
   0x1   :  { %14 = sst [smem:[#allocation2]] %s1211_s0 }
   0x2   :  { %15 = vsyncpa [#allocation4], 0 }
   0x3   :  { %17 = vsyncpa [#allocation4 + $0x1], 0  ;;  %s944_s11 = smov 0   ;;  %s946_s12 = smov 0  }
   0x4   :  { %s948_s13 = smov 0   ;;  %s950_s14 = smov 0  }
   0x5 LB: > { %s965_s0 = sadd.s32 4294967295, %s889_s14   ;;  %s726_s15 = sadd.s32 4294967294, %s889_s14   ;;  %s889_s14 = sphi %s950_s14, %s1226_s14   ;;  %s885_s13 = sphi %s948_s13, %s1225_s13   ;;  %s881_s12 = sphi %s946_s12, %s1224_s12   ;;  %s877_s11 = sphi %s944_s11, %s1223_s11  }
   0x6   : > { %s969_s16 = sadd.s32 1, %s889_s14   ;;  %s224_s17 = sadd.s32 1, %s885_s13 }
   0x7   : > { %s221_s18 = ssub.s32 %s889_s14, %s969_s16  ;;  %p234_p0 = scmp.ne.s32.totalorder %s885_s13, %s881_s12 }
   0x8   : > { %p222_p1 = scmp.eq.s32.totalorder %s221_s18, 0  ;;  %p235_p2 = scmp.eq.s32.totalorder %s965_s0, 1 }
   0x9   : > { %p240_p3 = scmp.ne.s32.totalorder %s881_s12, %s877_s11  ;;  %p241_p4 = scmp.eq.s32.totalorder %s726_s15, 1 }
   0xa   : > { %s980_s19 = scalar_select %p222_p1, %s885_s13, %s224_s17  }
   0xb   : > { %p982_p5 = por %p235_p2, %p234_p0  ;;  %p986_p6 = por %p241_p4, %p240_p3 }
   0xc   : > { %p729_p7 = scmp.ge.s32.totalorder %s889_s14, 1  ;;  %p292_p8 = scmp.lt.s32.totalorder %s889_s14, 3 }
   0xe   : > { %p293_p9 = pnand %p729_p7, %p292_p8 }
   0xf   : > { %s731_s23 = sshll.u32 (!%p293_p9), %s965_s0, 4  ;;  %s507_s18 = scalar_lea.vmem (!%p293_p9), %s1217_s6, %s965_s0 }
  0x10   : > { %296 = sbr.rel (%p293_p9) target bundleno = 866 (0x362), region = 56  ;;  %p329_p10 = scmp.lt.s32.totalorder (!%p293_p9), %s731_s23, 31 }
  0x11   : > { %s530_s15 = sld [smem:[#allocation2]] (!%p293_p9)  ;;  %s325_s22 = sand.u32 (!%p293_p9), 1, %s881_s12  }
  0x12   : > { %s651_s30 = scalar_lea.sflag (!%p293_p9), [#allocation4], %s325_s22 }
  0x15   : > { %v338_v0 = vld [vmem:[%s1213_s2 + $0x18] sm:$0xff]  ;;  %vm343_vm0 = vcmask 64512   ;;  %vm400_vm1 = vcmask 261120   ;;  %v337_v2 = vld [vmem:[%s1213_s2 + $0x10] sm:$0xff]  ;;  %v336_v4 = vld [vmem:[%s1213_s2 + $0x8] sm:$0xff]  ;;  %s1228_s23 = smov (!%p329_p10, %s731_s23), 31 }
  0x16   : > { %733 = vmatpush.xpose.msk.msra.mxu3 %vm343_vm0, %v338_v0  ;;  %v395_v1 = vld [vmem:[%s1215_s4 + $0x78] sm:$0xff]  ;;  %v394_v3 = vld [vmem:[%s1215_s4 + $0x70] sm:$0xff]  ;;  %v393_v5 = vld [vmem:[%s1215_s4 + $0x68] sm:$0xff]  ;;  %s732_s24 = sshll.u32 %s1228_s23, 3  ;;  %s730_s23 = sshll.u32 %s325_s22, 3 }
  0x17   : > { %738 = vmatpush.xpose.msk.msra.mxu1 %vm400_vm1, %v395_v1  ;;  %v335_v6 = vld [vmem:[%s1213_s2] sm:$0xff]  ;;  %v391_v9 = vld [vmem:[%s1215_s4 + $0x58] sm:$0xff]  ;;  %v390_v10 = vld [vmem:[%s1215_s4 + $0x50] sm:$0xff]  ;;  %s1080_s29 = scalar_lea.vmem %s1219_s8, %s732_s24  ;;  %s774_s24 = sshll.u32 %s965_s0, 3 }
  0x18   : > { %v392_v7 = vld [vmem:[%s1215_s4 + $0x60] sm:$0xff]  ;;  %v389_v11 = vld [vmem:[%s1215_s4 + $0x48] sm:$0xff]  ;;  %v387_v13 = vld [vmem:[%s1215_s4 + $0x38] sm:$0xff]  ;;  %s661_s26 = scalar_lea.hbm %s1220_s9, %s774_s24  ;;  %s327_s27 = scalar_lea.vmem [#allocation3], %s730_s23 }
  0x19   : > { %v334_v8 = vld [vmem:[%s1212_s1] sm:$0xff]  ;;  %v386_v14 = vld [vmem:[%s1215_s4 + $0x30] sm:$0xff]  ;;  %v385_v15 = vld [vmem:[%s1215_s4 + $0x28] sm:$0xff]  ;;  %s663_s28 = sshll.u32 %s327_s27, 4  ;;  %s847_s24 = scalar_lea.hbm %s1220_s9, 16  ;;  %s664_s28 = int_to_ptr.vmem [resolvable:$true] %s663_s28 }
  0x1a   : > { %734 = vmatpush.xpose.msk.msra.mxu3 %vm343_vm0, %v337_v2  ;;  %v388_v12 = vld [vmem:[%s1215_s4 + $0x40] sm:$0xff]  ;;  %v383_v17 = vld [vmem:[%s1215_s4 + $0x18] sm:$0xff]  ;;  %v382_v18 = vld [vmem:[%s1215_s4 + $0x10] sm:$0xff] }
  0x1b   : > { %739 = vmatpush.xpose.msk.msra.mxu1 %vm400_vm1, %v394_v3  ;;  %v384_v16 = vld [vmem:[%s1215_s4 + $0x20] sm:$0xff]  ;;  %v381_v19 = vld [vmem:[%s1215_s4 + $0x8] sm:$0xff]  ;;  %v506_v21 = vld [vmem:[%s1080_s29 + $0x78] sm:$0xff] }
  0x1c   : > { %v380_v20 = vld [vmem:[%s1215_s4] sm:$0xff]  ;;  %510 = vmatpush.xpose.msra.mxu2 %v506_v21  ;;  %v505_v22 = vld [vmem:[%s1080_s29 + $0x70] sm:$0xff]  ;;  %v504_v23 = vld [vmem:[%s1080_s29 + $0x68] sm:$0xff] }
  0x1d   : > { %v503_v24 = vld [vmem:[%s1080_s29 + $0x60] sm:$0xff]  ;;  %v502_v25 = vld [vmem:[%s1080_s29 + $0x58] sm:$0xff]  ;;  %v501_v26 = vld [vmem:[%s1080_s29 + $0x50] sm:$0xff] }
  0x1e   : > { %735 = vmatpush.xpose.msk.msra.mxu3 %vm343_vm0, %v336_v4  ;;  %v500_v27 = vld [vmem:[%s1080_s29 + $0x48] sm:$0xff]  ;;  %v816_v28 = vld [vmem:[%s1214_s3] ss:$0 sm:$0xff]  ;;  %v498_v33 = vld [vmem:[%s1080_s29 + $0x38] sm:$0xff] }
  0x1f   : > { %740 = vmatpush.xpose.msk.msra.mxu1 %vm400_vm1, %v393_v5  ;;  %v499_v29 = vld [vmem:[%s1080_s29 + $0x40] sm:$0xff]  ;;  %v497_v34 = vld [vmem:[%s1080_s29 + $0x30] sm:$0xff]  ;;  %v496_v35 = vld [vmem:[%s1080_s29 + $0x28] sm:$0xff]  ;;  %v531_v5 = vstv %s530_s15 }
  0x20   : > { %511 = vmatpush.xpose.msra.mxu2 %v505_v22  ;;  %v495_v36 = vld [vmem:[%s1080_s29 + $0x20] sm:$0xff]  ;;  %v494_v37 = vld [vmem:[%s1080_s29 + $0x18] sm:$0xff]  ;;  %v493_v38 = vld [vmem:[%s1080_s29 + $0x10] sm:$0xff] }
  0x21   : > { %v492_v39 = vld [vmem:[%s1080_s29 + $0x8] sm:$0xff]  ;;  %v491_v40 = vld [vmem:[%s1080_s29] sm:$0xff]  ;;  %v553_v57 = vld [vmem:[%s1218_s7 + $0x78] sm:$0xff]  ;;  %s665_s29 = sshll.u32 %s661_s26, 4  ;;  %s666_s29 = int_to_ptr.hbm [resolvable:$true] %s665_s29 }
  0x22   : > { %736 = vmatpush.xpose.msk.msra.mxu3 %vm343_vm0, %v335_v6  ;;  %v817_v41 = vld [vmem:[%s1216_s5] ss:$0 sm:$0xff]  ;;  %v552_v58 = vld [vmem:[%s1218_s7 + $0x70] sm:$0xff]  ;;  %756 = vmatpush.xpose.msk.msra.mxu0 %vm400_vm1, %v553_v57  ;;  %v551_v59 = vld [vmem:[%s1218_s7 + $0x68] sm:$0xff]  ;;  %s841_s10 = sshra.s32 %s666_s29, 4  ;;  %s842_s10 = int_to_ptr.hbm [resolvable:$true] %s841_s10 }
  0x23   : > { %741 = vmatpush.xpose.msk.msra.mxu1 %vm400_vm1, %v392_v7  ;;  %v550_v60 = vld [vmem:[%s1218_s7 + $0x60] sm:$0xff]  ;;  %v549_v61 = vld [vmem:[%s1218_s7 + $0x58] sm:$0xff]  ;;  %v548_v62 = vld [vmem:[%s1218_s7 + $0x50] sm:$0xff]  ;;  %s843_s15 = scalar_lea.hbm %s842_s10, 8  ;;  %p848_p0 = scmp.lt.s32.totalorder %s842_s10, %s1220_s9 }
  0x24   : > { %512 = vmatpush.xpose.msra.mxu2 %v504_v23  ;;  %v547_v63 = vld [vmem:[%s1218_s7 + $0x48] sm:$0xff]  ;;  %v546_v0 = vld [vmem:[%s1218_s7 + $0x40] sm:$0xff]  ;;  %v545_v1 = vld [vmem:[%s1218_s7 + $0x38] sm:$0xff]  ;;  %p844_p11 = scmp.ne.s32.totalorder %s842_s10, %s843_s15  ;;  %p849_p1 = scmp.lt.s32.totalorder %s847_s24, %s843_s15 }
  0x25   : > { %737 = vmatmul.msk.f32.vlgmr.msra.gmra.mxu3 %vm343_vm0, %v334_v8  ;;  %v544_v2 = vld [vmem:[%s1218_s7 + $0x30] sm:$0xff]  ;;  %v818_v3 = vld [vmem:[%s507_s18] ss:$0 sm:$0xff]  ;;  %v543_v8 = vld [vmem:[%s1218_s7 + $0x28] sm:$0xff] }
  0x26   : > { %554 = vmatpush.msrb.mxu3 %v553_v57  ;;  %757 = vmatpush.xpose.msk.msra.mxu0 %vm400_vm1, %v552_v58  ;;  %p845_p12 = pnand %p844_p11, %p982_p5  ;;  %p850_p2 = por %p849_p1, %p848_p0 }
  0x27   : > { %742 = vmatpush.xpose.msk.msra.mxu1 %vm400_vm1, %v391_v9  ;;  %v542_v9 = vld [vmem:[%s1218_s7 + $0x20] sm:$0xff] }
  0x28   : > { %513 = vmatpush.xpose.msra.mxu2 %v503_v24  ;;  %555 = vmatpush.msrb.mxu3 %v552_v58  ;;  %p846_p13 = pneg %p845_p12 }
  0x2a   : > { %556 = vmatpush.msrb.mxu3 %v551_v59  ;;  %758 = vmatpush.xpose.msk.msra.mxu0 %vm400_vm1, %v551_v59  ;;  %p851_p3 = pnand %p850_p2, %p846_p13 }
  0x2b   : > { %743 = vmatpush.xpose.msk.msra.mxu1 %vm400_vm1, %v390_v10  ;;  %v541_v10 = vld [vmem:[%s1218_s7 + $0x18] sm:$0xff] }
  0x2c   : > { %514 = vmatpush.xpose.msra.mxu2 %v502_v25  ;;  %557 = vmatpush.msrb.mxu3 %v550_v60 }
  0x2e   : > { %558 = vmatpush.msrb.mxu3 %v549_v61  ;;  %759 = vmatpush.xpose.msk.msra.mxu0 %vm400_vm1, %v550_v60 }
  0x2f   : > { %744 = vmatpush.xpose.msk.msra.mxu1 %vm400_vm1, %v389_v11  ;;  %v540_v11 = vld [vmem:[%s1218_s7 + $0x10] sm:$0xff] }
  0x30   : > { %515 = vmatpush.xpose.msra.mxu2 %v501_v26  ;;  %559 = vmatpush.msrb.mxu3 %v548_v62 }
  0x32   : > { %560 = vmatpush.msrb.mxu3 %v547_v63  ;;  %760 = vmatpush.xpose.msk.msra.mxu0 %vm400_vm1, %v549_v61 }
  0x33   : > { %745 = vmatpush.xpose.msk.msra.mxu1 %vm400_vm1, %v388_v12  ;;  %v539_v12 = vld [vmem:[%s1218_s7 + $0x8] sm:$0xff] }
  0x34   : > { %516 = vmatpush.xpose.msra.mxu2 %v500_v27  ;;  %561 = vmatpush.msrb.mxu3 %v546_v0 }
  0x36   : > { %562 = vmatpush.msrb.mxu3 %v545_v1  ;;  %761 = vmatpush.xpose.msk.msra.mxu0 %vm400_vm1, %v548_v62 }
  0x37   : > { %746 = vmatpush.xpose.msk.msra.mxu1 %vm400_vm1, %v387_v13  ;;  %v538_v13 = vld [vmem:[%s1218_s7] sm:$0xff] }
  0x38   : > { %517 = vmatpush.xpose.msra.mxu2 %v499_v29  ;;  %563 = vmatpush.msrb.mxu3 %v544_v2 }
  0x3a   : > { %762 = vmatpush.xpose.msk.msra.mxu0 %vm400_vm1, %v547_v63  ;;  %564 = vmatpush.msrb.mxu3 %v543_v8 }
  0x3b   : > { %747 = vmatpush.xpose.msk.msra.mxu1 %vm400_vm1, %v386_v14 }
  0x3c   : > { %518 = vmatpush.xpose.msra.mxu2 %v498_v33  ;;  %565 = vmatpush.msrb.mxu3 %v542_v9 }
  0x3e   : > { %763 = vmatpush.xpose.msk.msra.mxu0 %vm400_vm1, %v546_v0  ;;  %566 = vmatpush.msrb.mxu3 %v541_v10 }
  0x3f   : > { %748 = vmatpush.xpose.msk.msra.mxu1 %vm400_vm1, %v385_v15 }
  0x40   : > { %519 = vmatpush.xpose.msra.mxu2 %v497_v34  ;;  %567 = vmatpush.msrb.mxu3 %v540_v11 }
  0x42   : > { %764 = vmatpush.xpose.msk.msra.mxu0 %vm400_vm1, %v545_v1  ;;  %568 = vmatpush.msrb.mxu3 %v539_v12 }
  0x43   : > { %749 = vmatpush.xpose.msk.msra.mxu1 %vm400_vm1, %v384_v16 }
  0x44   : > { %520 = vmatpush.xpose.msra.mxu2 %v496_v35  ;;  %569 = vmatpush.msrb.mxu3 %v538_v13 }
  0x46   : > { %765 = vmatpush.xpose.msk.msra.mxu0 %vm400_vm1, %v544_v2 }
  0x47   : > { %750 = vmatpush.xpose.msk.msra.mxu1 %vm400_vm1, %v383_v17 }
  0x48   : > { %521 = vmatpush.xpose.msra.mxu2 %v495_v36 }
  0x4a   : > { %766 = vmatpush.xpose.msk.msra.mxu0 %vm400_vm1, %v543_v8 }
  0x4b   : > { %751 = vmatpush.xpose.msk.msra.mxu1 %vm400_vm1, %v382_v18 }
  0x4c   : > { %522 = vmatpush.xpose.msra.mxu2 %v494_v37 }
  0x4e   : > { %767 = vmatpush.xpose.msk.msra.mxu0 %vm400_vm1, %v542_v9 }
  0x4f   : > { %752 = vmatpush.xpose.msk.msra.mxu1 %vm400_vm1, %v381_v19 }
  0x50   : > { %523 = vmatpush.xpose.msra.mxu2 %v493_v38 }
  0x52   : > { %768 = vmatpush.xpose.msk.msra.mxu0 %vm400_vm1, %v541_v10 }
  0x53   : > { %753 = vmatpush.xpose.msk.msra.mxu1 %vm400_vm1, %v380_v20 }
  0x54   : > { %524 = vmatpush.xpose.msra.mxu2 %v492_v39 }
  0x56   : > { %769 = vmatpush.xpose.msk.msra.mxu0 %vm400_vm1, %v540_v11 }
  0x58   : > { %525 = vmatpush.xpose.msra.mxu2 %v491_v40 }
  0x5a   : > { %770 = vmatpush.xpose.msk.msra.mxu0 %vm400_vm1, %v539_v12 }
  0x5e   : > { %771 = vmatpush.xpose.msk.msra.mxu0 %vm400_vm1, %v538_v13 }
  0xa8   : > { %v376_v30 = vpop.f32.mrf.mxu3 }
  0xa9   : > { %v377_v31 = vadd.f32 %v816_v28, %v376_v30 }
  0xab   : > { %v379_v32 = vmax.f32 %v377_v31, 0.0 }
  0xad   : > { %754 = vmatmul.msk.f32.vlgmr.msra.gmra.mxu1 %vm400_vm1, %v379_v32 }
 0x12a   : > { %v469_v42 = vpop.f32.mrf.mxu1 }
 0x12b   : > { %v470_v43 = vadd.f32 %v817_v41, %v469_v42 }
 0x12d   : > { %v755_v44 = vmul.f32 -1.442695, %v470_v43 }
 0x12f   : > { %819 = vpow2.f32 %v755_v44 }
 0x135   : > { %v820_v45 = vpop.eup %819 }
 0x136   : > { %v475_v46 = vadd.f32 1.0, %v820_v45 }
 0x138   : > { %821 = vrcp.f32 %v475_v46  ;;  %v487_v50 = vand.u32 2147483648, %v475_v46  ;;  %v485_v52 = vand.u32 2147483647, %v475_v46  ;;  %vm481_vm3 = vweird.f32 %v475_v46 }
 0x13a   : > { %v488_v54 = vor.u32 1.1754944e-38, %v487_v50  ;;  %vm486_vm5 = vcmp.eq.f32.partialorder %v485_v52, 8.507059e+37 }
 0x13e   : > { %v822_v47 = vpop.eup %821 }
 0x13f   : > { %v477_v48 = vmul.f32 %v822_v47, %v475_v46  ;;  %vm482_vm2 = vweird.f32 %v822_v47 }
 0x140   : > { %vm483_vm4 = vmor %vm481_vm3, %vm482_vm2 }
 0x141   : > { %v478_v49 = vsub.f32 1.0, %v477_v48 }
 0x143   : > { %v479_v51 = vmul.f32 %v822_v47, %v478_v49 }
 0x145   : > { %v480_v53 = vadd.f32 %v822_v47, %v479_v51 }
 0x147   : > { %v484_v55 = vsel %vm483_vm4, %v822_v47, %v480_v53 }
 0x148   : > { %v489_v56 = vsel %vm486_vm5, %v488_v54, %v484_v55 }
 0x149   : > { %526 = vmatmul.f32.vlgmr.msra.gmra.mxu2 %v489_v56 }
 0x1cc   : > { %v527_v4 = vpop.f32.mrf.mxu2 }
 0x1cd   : > { %v528_v6 = vadd.f32 %v818_v3, %v527_v4 }
 0x1cf   : > { %v532_v7 = vmul.f32 %v531_v5, %v528_v6 }
 0x1d1   : > { %533 = vmax.xlane.f32.xlu0 %v532_v7 }
 0x244   : > { %v534_v14 = vpop.xlane.xlu0 %533 }
 0x245   : > { %v535_v15 = vsub.f32 %v532_v7, %v534_v14 }
 0x247   : > { %v536_v16 = vmul.f32 1.442695, %v535_v15 }
 0x249   : > { %823 = vpow2.f32 %v536_v16 }
 0x24f   : > { %v824_v17 = vpop.eup %823 }
 0x250   : > { %570 = vmatmul.f32.vlgmr.msrb.gmra.mxu3 %v824_v17 }
 0x2d3   : > { %v571_v18 = vpop.f32.mrf.mxu3 }
 0x2d4   : > { %v574_v19 = vmax.f32 %v571_v18, 1e-30 }
 0x2d6   : > { %825 = vlog2.f32 %v574_v19 }
 0x2dc   : > { %v826_v20 = vpop.eup %825 }
 0x2dd   : > { %v576_v21 = vmul.f32 0.6931472, %v826_v20 }
 0x2df   : > { %772 = vmatmul.msk.f32.vlgmr.msra.gmra.mxu0 %vm400_vm1, %v576_v21 }
 0x35c   : > { %v645_v22 = vpop.f32.mrf.mxu0 }
 0x35d   : > { %v648_v23 = vsub.f32 %v535_v15, %v645_v22 }
 0x35f   : > { %649 = vst [vmem:[%s327_s27] sm:$0xff] %v648_v23 }
 0x360   : > { %854 = shalt.err (!%p851_p3)
}
 0x361   : > { %777 = dma.vmem_to_hbm [thread:$0]  (%p982_p5), %s664_s28, 128, %s666_s29, %s651_s30  }
 0x362 PF: > { %p783_p4 = scmp.ge.s32.totalorder %s889_s14, 2  ;;  %s677_s22 = sand.u32 1, %s877_s11  }
 0x363   : > { %s678_s25 = scalar_lea.sflag [#allocation4], %s677_s22 }
 0x364   : > { %p780_p7 = pnand %p783_p4, %p986_p6 }
 0x366   : > { %p781_p8 = pneg %p780_p7 }
 0x368   : > { %872 = dma.done.wait (%p781_p8), %s678_s25, 128  }
 0x369   : > { %874 = vsyncadd (%p781_p8), %s678_s25, 4294967168  ;;  %p20_p9 = scmp.ge.s32.totalorder %s969_s16, 4   ;;  %s1223_s11 = smov %s881_s12 }
 0x36a   : > { %s1224_s12 = smov %s885_s13  ;;  %s1225_s13 = smov %s980_s19 }
 0x36b   : > { %s1226_s14 = smov %s969_s16  ;;  %22 = sbr.rel (!%p20_p9) target bundleno = 5 (0x5), region = 92 }
 0x370   :  { %684 = vsyncpa [#allocation4], 1 }
 0x371   :  { %686 = vsyncpa [#allocation4 + $0x1], 1 }

</bundles_post_ra>
